<compile_context>
chip_gen: v7x
topology: tpu7x:2x2x1
jax: 0.10.0
libtpu: 0.0.40
codegen_flags: <defaults>
</compile_context>

<pallas_src>
import jax
import jax.numpy as jnp
from jax.experimental import pallas as pl
from jax.experimental.pallas import tpu as pltpu


# ----------------------------- Pallas kernel ------------------------------

def _fused_backbone_kernel(x1_ref, w1_ref, b1_ref, pool_ref, gat_ref,
                           w2_ref, b2_ref, o_ref):
    # x1_ref  : (B*9*Cin, HW)    conv1 im2col for B images (batch-major rows)
    # w1_ref  : (B*C1, B*9*Cin)  block-diagonal conv1 weights
    # b1_ref  : (B*C1, 1)
    # pool_ref: (HW, P2)         exact 0/0.25 AvgPool2d(2) matrix
    # gat_ref : (P2, 9*P2)       exact 0/1 conv2 SAME-pad tap-gather (k-major cols)
    # w2_ref  : (9, B*C2, B*C1)  per-tap block-diagonal conv2 weights
    # b2_ref  : (B*C2, 1)
    # o_ref   : (B*C2, 1)
    P2 = pool_ref.shape[1]
    BC2 = w2_ref.shape[1]

    # conv1 (3x3 SAME) for the whole batch: one MXU matmul, K = B*9*Cin.
    a1 = jnp.dot(w1_ref[...], x1_ref[...],
                 preferred_element_type=jnp.float32)              # (B*C1, HW)
    r1 = jnp.maximum(a1 + b1_ref[...], 0.0)                       # lane-dense

    # AvgPool2d(2): one matmul against the exact pool matrix (acts on lanes).
    pooled = jnp.dot(r1, pool_ref[...],
                     preferred_element_type=jnp.float32)          # (B*C1, P2)

    # conv2 im2col gather with SAME zero-padding folded in: one 0/1 matmul.
    g = jnp.dot(pooled, gat_ref[...],
                preferred_element_type=jnp.float32)               # (B*C1, 9*P2)

    # conv2 (3x3): 9 per-tap matmuls on static lane slices of g.
    acc2 = jnp.zeros((BC2, P2), jnp.float32)
    for k in range(9):
        acc2 = acc2 + jnp.dot(w2_ref[k], g[:, k * P2:(k + 1) * P2],
                              preferred_element_type=jnp.float32)
    r2 = jnp.maximum(acc2 + b2_ref[...], 0.0)                     # (B*C2, P2)

    # AdaptiveAvgPool2d(1) + flatten: mean over the spatial lane axis.
    o_ref[...] = jnp.mean(r2, axis=1, keepdims=True).astype(o_ref.dtype)


# ------------------------------ JAX wrapper --------------------------------

@jax.jit
def feature_extractor_forward(x_nchw, params):
    """Equivalent of FeatureExtractor.forward: backbone minus head, flattened."""
    w1, b1, w2, b2 = params
    N, Cin, H, W = x_nchw.shape
    C1 = w1.shape[-1]
    C2 = w2.shape[-1]
    assert H % 2 == 0 and W % 2 == 0  # AvgPool2d(2) floor semantics not needed
    H2, W2 = H // 2, W // 2
    HW, P2 = H * W, H2 * W2
    B = N                 # images per grid step (N=2 -> a single grid step)
    S = N // B
    f32 = jnp.float32

    # ---- conv1 im2col (tiny XLA glue, ~73 KB for the whole batch) ----
    xpad = jnp.pad(x_nchw, ((0, 0), (0, 0), (1, 1), (1, 1)))
    taps = [xpad[:, :, dy:dy + H, dx:dx + W].reshape(N, Cin, HW)
            for dy in range(3) for dx in range(3)]
    # rows per image ordered j = k*Cin + ci  (k = dy*3+dx), batch-major overall.
    x1 = jnp.concatenate(taps, axis=1).reshape(N * 9 * Cin, HW).astype(f32)

    # ---- weights in (C_out, 9*C_in) row form, block-diagonal over B images ----
    w1m = jnp.transpose(w1.reshape(9, Cin, C1), (2, 0, 1)).reshape(C1, 9 * Cin)
    w1bd = jnp.kron(jnp.eye(B, dtype=f32), w1m.astype(f32))       # (B*C1, B*9*Cin)
    b1t = jnp.tile(b1.astype(f32), B).reshape(B * C1, 1)

    w2t = jnp.transpose(w2.reshape(9, C1, C2), (0, 2, 1)).astype(f32)  # (9,C2,C1)
    w2bd = jax.vmap(lambda m: jnp.kron(jnp.eye(B, dtype=f32), m))(w2t)  # (9,B*C2,B*C1)
    b2t = jnp.tile(b2.astype(f32), B).reshape(B * C2, 1)

    # ---- exact constant matrices (values 0 / 0.25 / 1) ----
    s = jnp.arange(HW)
    hh, ww = s // W, s % W
    p = jnp.arange(P2)
    ho, wo = p // W2, p % W2
    # AvgPool2d(2): pool[h*W+w, ho*W2+wo] = 0.25 iff (h//2, w//2) == (ho, wo).
    pool = jnp.where((hh[:, None] // 2 == ho[None, :]) &
                     (ww[:, None] // 2 == wo[None, :]), 0.25, 0.0).astype(f32)

    # conv2 tap gather: gat[p_in, k*P2 + p_out] = 1 iff pooled pixel p_in is the
    # tap-k input of output p_out; SAME zero-pad border rows stay all-zero.
    kk = jnp.arange(9)
    dy, dx = kk // 3, kk % 3
    hi = ho[None, :] + dy[:, None] - 1                              # (9, P2)
    wi = wo[None, :] + dx[:, None] - 1
    valid = (hi >= 0) & (hi < H2) & (wi >= 0) & (wi < W2)
    src = hi * W2 + wi
    gat = jnp.where((p[:, None, None] == src[None, :, :]) & valid[None, :, :],
                    1.0, 0.0).astype(f32).reshape(P2, 9 * P2)

    flops = S * (2 * (B * C1) * (B * 9 * Cin) * HW        # conv1
                 + 2 * (B * C1) * HW * P2                 # avgpool matmul
                 + 2 * (B * C1) * P2 * (9 * P2)           # conv2 gather
                 + 9 * 2 * (B * C2) * (B * C1) * P2       # conv2 taps
                 + (B * C2) * P2)                         # global mean
    # Weight/constant operands are VMEM-resident; x1 is the only streamed input.
    bytes_accessed = 4 * (x1.size + w1bd.size + b1t.size + pool.size
                          + gat.size + w2bd.size + b2t.size + N * C2)

    out = pl.pallas_call(
        _fused_backbone_kernel,
        out_shape=jax.ShapeDtypeStruct((N * C2, 1), x_nchw.dtype),
        grid=(S,),
        in_specs=[
            pl.BlockSpec((B * 9 * Cin, HW), lambda i: (i, 0)),
            pl.BlockSpec((B * C1, B * 9 * Cin), lambda i: (0, 0)),
            pl.BlockSpec((B * C1, 1), lambda i: (0, 0)),
            pl.BlockSpec((HW, P2), lambda i: (0, 0)),
            pl.BlockSpec((P2, 9 * P2), lambda i: (0, 0)),
            pl.BlockSpec((9, B * C2, B * C1), lambda i: (0, 0, 0)),
            pl.BlockSpec((B * C2, 1), lambda i: (0, 0)),
        ],
        out_specs=pl.BlockSpec((B * C2, 1), lambda i: (i, 0)),
        compiler_params=pltpu.CompilerParams(
            dimension_semantics=("parallel",)),
        cost_estimate=pl.CostEstimate(
            flops=flops, transcendentals=0, bytes_accessed=bytes_accessed),
    )(x1, w1bd, b1t, pool, gat, w2bd, b2t)

    return out.reshape(N, C2)                 # == x.view(x.size(0), -1)


# ------------------------- pure-JAX reference ------------------------------

def _reference_forward(x_nchw, params):
    w1, b1, w2, b2 = params
    x = jnp.transpose(x_nchw, (0, 2, 3, 1))
    dn = ("NHWC", "HWIO", "NHWC")
    x = jax.lax.conv_general_dilated(x, w1, (1, 1), "SAME",
                                     dimension_numbers=dn) + b1
    x = jnp.maximum(x, 0.0)
    N, H, W, C = x.shape
    x = x.reshape(N, H // 2, 2, W // 2, 2, C).mean(axis=(2, 4))
    x = jax.lax.conv_general_dilated(x, w2, (1, 1), "SAME",
                                     dimension_numbers=dn) + b2
    x = jnp.maximum(x, 0.0)
    x = x.mean(axis=(1, 2))
    return x.reshape(x.shape[0], -1)


# --------------------------------- main ------------------------------------

if __name__ == "__main__":
    N, C_IN, H, W = 2, 4, 16, 16
    C1, C2 = 8, 16

    key = jax.random.PRNGKey(0)
    kx, k1, k2, k3, k4 = jax.random.split(key, 5)

    # Deterministic synthetic parameters (HWIO conv weights).
    w1 = jax.random.normal(k1, (3, 3, C_IN, C1), jnp.float32) * 0.1
    b1 = jax.random.normal(k2, (C1,), jnp.float32) * 0.1
    w2 = jax.random.normal(k3, (3, 3, C1, C2), jnp.float32) * 0.1
    b2 = jax.random.normal(k4, (C2,), jnp.float32) * 0.1
    params = (w1, b1, w2, b2)

    x = jax.random.normal(kx, (N, C_IN, H, W), jnp.float32)

    out = jax.block_until_ready(feature_extractor_forward(x, params))
    assert out.shape == (N, C2), out.shape

    ref = jax.block_until_ready(_reference_forward(x, params))
    assert jnp.allclose(out, ref, atol=1e-4, rtol=1e-4), (
        f"max abs err = {jnp.max(jnp.abs(out - ref))}")

    print("KERNEL_OK")
</pallas_src>

<mosaic_0001>
module attributes {stable_mosaic.version = 11 : i64} {
  func.func @_fused_backbone_kernel(%arg0: i32, %arg1: memref<72x256xf32, #tpu.memory_space<vmem>>, %arg2: memref<16x72xf32, #tpu.memory_space<vmem>>, %arg3: memref<16x1xf32, #tpu.memory_space<vmem>>, %arg4: memref<256x64xf32, #tpu.memory_space<vmem>>, %arg5: memref<64x576xf32, #tpu.memory_space<vmem>>, %arg6: memref<9x32x16xf32, #tpu.memory_space<vmem>>, %arg7: memref<32x1xf32, #tpu.memory_space<vmem>>, %arg8: memref<32x1xf32, #tpu.memory_space<vmem>>) attributes {dimension_semantics = [#tpu.dimension_semantics<parallel>], iteration_bounds = array<i64: 1>, scalar_prefetch = 0 : i64, scratch_operands = 0 : i64, tpu.core_type = #tpu.core_type<tc>, window_params = [{transform_indices = @transform_0, window_bounds = array<i64: 72, 256>}, {pipeline_mode = #tpu.pipeline_mode<synchronous>, transform_indices = @transform_1, window_bounds = array<i64: 16, 72>}, {pipeline_mode = #tpu.pipeline_mode<synchronous>, transform_indices = @transform_2, window_bounds = array<i64: 16, 1>}, {pipeline_mode = #tpu.pipeline_mode<synchronous>, transform_indices = @transform_3, window_bounds = array<i64: 256, 64>}, {pipeline_mode = #tpu.pipeline_mode<synchronous>, transform_indices = @transform_4, window_bounds = array<i64: 64, 576>}, {pipeline_mode = #tpu.pipeline_mode<synchronous>, transform_indices = @transform_5, window_bounds = array<i64: 9, 32, 16>}, {pipeline_mode = #tpu.pipeline_mode<synchronous>, transform_indices = @transform_6, window_bounds = array<i64: 32, 1>}, {transform_indices = @transform_7, window_bounds = array<i64: 32, 1>}]} {
    %c0 = arith.constant 0 : index
    %c0_0 = arith.constant 0 : index
    %0 = vector.load %arg2[%c0, %c0_0] : memref<16x72xf32, #tpu.memory_space<vmem>>, vector<16x72xf32>
    %c0_1 = arith.constant 0 : index
    %c0_2 = arith.constant 0 : index
    %1 = vector.load %arg1[%c0_1, %c0_2] : memref<72x256xf32, #tpu.memory_space<vmem>>, vector<72x256xf32>
    %cst = arith.constant dense<0.000000e+00> : vector<16x256xf32>
    %2 = tpu.matmul %0, %1, %cst {dimension_numbers = #tpu.dot_dimension_numbers<[1], [0], [0], [1], [0, 0, 1, 1], [], []>} : vector<16x72xf32>, vector<72x256xf32>, vector<16x256xf32> -> vector<16x256xf32>
    %c0_3 = arith.constant 0 : index
    %c0_4 = arith.constant 0 : index
    %3 = vector.load %arg3[%c0_3, %c0_4] : memref<16x1xf32, #tpu.memory_space<vmem>>, vector<16x1xf32>
    %4 = vector.broadcast %3 : vector<16x1xf32> to vector<16x256xf32>
    %5 = arith.addf %2, %4 : vector<16x256xf32>
    %cst_5 = arith.constant 0.000000e+00 : f32
    %6 = vector.broadcast %cst_5 : f32 to vector<16x256xf32>
    %7 = arith.maximumf %5, %6 : vector<16x256xf32>
    %c0_6 = arith.constant 0 : index
    %c0_7 = arith.constant 0 : index
    %8 = vector.load %arg4[%c0_6, %c0_7] : memref<256x64xf32, #tpu.memory_space<vmem>>, vector<256x64xf32>
    %cst_8 = arith.constant dense<0.000000e+00> : vector<16x64xf32>
    %9 = tpu.matmul %7, %8, %cst_8 {dimension_numbers = #tpu.dot_dimension_numbers<[1], [0], [0], [1], [0, 0, 1, 1], [], []>} : vector<16x256xf32>, vector<256x64xf32>, vector<16x64xf32> -> vector<16x64xf32>
    %c0_9 = arith.constant 0 : index
    %c0_10 = arith.constant 0 : index
    %10 = vector.load %arg5[%c0_9, %c0_10] : memref<64x576xf32, #tpu.memory_space<vmem>>, vector<64x576xf32>
    %cst_11 = arith.constant dense<0.000000e+00> : vector<16x576xf32>
    %11 = tpu.matmul %9, %10, %cst_11 {dimension_numbers = #tpu.dot_dimension_numbers<[1], [0], [0], [1], [0, 0, 1, 1], [], []>} : vector<16x64xf32>, vector<64x576xf32>, vector<16x576xf32> -> vector<16x576xf32>
    %cst_12 = arith.constant 0.000000e+00 : f32
    %12 = vector.broadcast %cst_12 : f32 to vector<32x64xf32>
    %c0_13 = arith.constant 0 : index
    %c0_14 = arith.constant 0 : index
    %c0_15 = arith.constant 0 : index
    %13 = vector.load %arg6[%c0_13, %c0_14, %c0_15] : memref<9x32x16xf32, #tpu.memory_space<vmem>>, vector<1x32x16xf32>
    %14 = vector.shape_cast %13 : vector<1x32x16xf32> to vector<32x16xf32>
    %15 = vector.extract_strided_slice %11 {offsets = [0, 0], sizes = [16, 64], strides = [1, 1]} : vector<16x576xf32> to vector<16x64xf32>
    %cst_16 = arith.constant dense<0.000000e+00> : vector<32x64xf32>
    %16 = tpu.matmul %14, %15, %cst_16 {dimension_numbers = #tpu.dot_dimension_numbers<[1], [0], [0], [1], [0, 0, 1, 1], [], []>} : vector<32x16xf32>, vector<16x64xf32>, vector<32x64xf32> -> vector<32x64xf32>
    %17 = arith.addf %12, %16 : vector<32x64xf32>
    %c1 = arith.constant 1 : index
    %c0_17 = arith.constant 0 : index
    %c0_18 = arith.constant 0 : index
    %18 = vector.load %arg6[%c1, %c0_17, %c0_18] : memref<9x32x16xf32, #tpu.memory_space<vmem>>, vector<1x32x16xf32>
    %19 = vector.shape_cast %18 : vector<1x32x16xf32> to vector<32x16xf32>
    %20 = vector.extract_strided_slice %11 {offsets = [0, 64], sizes = [16, 64], strides = [1, 1]} : vector<16x576xf32> to vector<16x64xf32>
    %cst_19 = arith.constant dense<0.000000e+00> : vector<32x64xf32>
    %21 = tpu.matmul %19, %20, %cst_19 {dimension_numbers = #tpu.dot_dimension_numbers<[1], [0], [0], [1], [0, 0, 1, 1], [], []>} : vector<32x16xf32>, vector<16x64xf32>, vector<32x64xf32> -> vector<32x64xf32>
    %22 = arith.addf %17, %21 : vector<32x64xf32>
    %c2 = arith.constant 2 : index
    %c0_20 = arith.constant 0 : index
    %c0_21 = arith.constant 0 : index
    %23 = vector.load %arg6[%c2, %c0_20, %c0_21] : memref<9x32x16xf32, #tpu.memory_space<vmem>>, vector<1x32x16xf32>
    %24 = vector.shape_cast %23 : vector<1x32x16xf32> to vector<32x16xf32>
    %25 = vector.extract_strided_slice %11 {offsets = [0, 128], sizes = [16, 64], strides = [1, 1]} : vector<16x576xf32> to vector<16x64xf32>
    %cst_22 = arith.constant dense<0.000000e+00> : vector<32x64xf32>
    %26 = tpu.matmul %24, %25, %cst_22 {dimension_numbers = #tpu.dot_dimension_numbers<[1], [0], [0], [1], [0, 0, 1, 1], [], []>} : vector<32x16xf32>, vector<16x64xf32>, vector<32x64xf32> -> vector<32x64xf32>
    %27 = arith.addf %22, %26 : vector<32x64xf32>
    %c3 = arith.constant 3 : index
    %c0_23 = arith.constant 0 : index
    %c0_24 = arith.constant 0 : index
    %28 = vector.load %arg6[%c3, %c0_23, %c0_24] : memref<9x32x16xf32, #tpu.memory_space<vmem>>, vector<1x32x16xf32>
    %29 = vector.shape_cast %28 : vector<1x32x16xf32> to vector<32x16xf32>
    %30 = vector.extract_strided_slice %11 {offsets = [0, 192], sizes = [16, 64], strides = [1, 1]} : vector<16x576xf32> to vector<16x64xf32>
    %cst_25 = arith.constant dense<0.000000e+00> : vector<32x64xf32>
    %31 = tpu.matmul %29, %30, %cst_25 {dimension_numbers = #tpu.dot_dimension_numbers<[1], [0], [0], [1], [0, 0, 1, 1], [], []>} : vector<32x16xf32>, vector<16x64xf32>, vector<32x64xf32> -> vector<32x64xf32>
    %32 = arith.addf %27, %31 : vector<32x64xf32>
    %c4 = arith.constant 4 : index
    %c0_26 = arith.constant 0 : index
    %c0_27 = arith.constant 0 : index
    %33 = vector.load %arg6[%c4, %c0_26, %c0_27] : memref<9x32x16xf32, #tpu.memory_space<vmem>>, vector<1x32x16xf32>
    %34 = vector.shape_cast %33 : vector<1x32x16xf32> to vector<32x16xf32>
    %35 = vector.extract_strided_slice %11 {offsets = [0, 256], sizes = [16, 64], strides = [1, 1]} : vector<16x576xf32> to vector<16x64xf32>
    %cst_28 = arith.constant dense<0.000000e+00> : vector<32x64xf32>
    %36 = tpu.matmul %34, %35, %cst_28 {dimension_numbers = #tpu.dot_dimension_numbers<[1], [0], [0], [1], [0, 0, 1, 1], [], []>} : vector<32x16xf32>, vector<16x64xf32>, vector<32x64xf32> -> vector<32x64xf32>
    %37 = arith.addf %32, %36 : vector<32x64xf32>
    %c5 = arith.constant 5 : index
    %c0_29 = arith.constant 0 : index
    %c0_30 = arith.constant 0 : index
    %38 = vector.load %arg6[%c5, %c0_29, %c0_30] : memref<9x32x16xf32, #tpu.memory_space<vmem>>, vector<1x32x16xf32>
    %39 = vector.shape_cast %38 : vector<1x32x16xf32> to vector<32x16xf32>
    %40 = vector.extract_strided_slice %11 {offsets = [0, 320], sizes = [16, 64], strides = [1, 1]} : vector<16x576xf32> to vector<16x64xf32>
    %cst_31 = arith.constant dense<0.000000e+00> : vector<32x64xf32>
    %41 = tpu.matmul %39, %40, %cst_31 {dimension_numbers = #tpu.dot_dimension_numbers<[1], [0], [0], [1], [0, 0, 1, 1], [], []>} : vector<32x16xf32>, vector<16x64xf32>, vector<32x64xf32> -> vector<32x64xf32>
    %42 = arith.addf %37, %41 : vector<32x64xf32>
    %c6 = arith.constant 6 : index
    %c0_32 = arith.constant 0 : index
    %c0_33 = arith.constant 0 : index
    %43 = vector.load %arg6[%c6, %c0_32, %c0_33] : memref<9x32x16xf32, #tpu.memory_space<vmem>>, vector<1x32x16xf32>
    %44 = vector.shape_cast %43 : vector<1x32x16xf32> to vector<32x16xf32>
    %45 = vector.extract_strided_slice %11 {offsets = [0, 384], sizes = [16, 64], strides = [1, 1]} : vector<16x576xf32> to vector<16x64xf32>
    %cst_34 = arith.constant dense<0.000000e+00> : vector<32x64xf32>
    %46 = tpu.matmul %44, %45, %cst_34 {dimension_numbers = #tpu.dot_dimension_numbers<[1], [0], [0], [1], [0, 0, 1, 1], [], []>} : vector<32x16xf32>, vector<16x64xf32>, vector<32x64xf32> -> vector<32x64xf32>
    %47 = arith.addf %42, %46 : vector<32x64xf32>
    %c7 = arith.constant 7 : index
    %c0_35 = arith.constant 0 : index
    %c0_36 = arith.constant 0 : index
    %48 = vector.load %arg6[%c7, %c0_35, %c0_36] : memref<9x32x16xf32, #tpu.memory_space<vmem>>, vector<1x32x16xf32>
    %49 = vector.shape_cast %48 : vector<1x32x16xf32> to vector<32x16xf32>
    %50 = vector.extract_strided_slice %11 {offsets = [0, 448], sizes = [16, 64], strides = [1, 1]} : vector<16x576xf32> to vector<16x64xf32>
    %cst_37 = arith.constant dense<0.000000e+00> : vector<32x64xf32>
    %51 = tpu.matmul %49, %50, %cst_37 {dimension_numbers = #tpu.dot_dimension_numbers<[1], [0], [0], [1], [0, 0, 1, 1], [], []>} : vector<32x16xf32>, vector<16x64xf32>, vector<32x64xf32> -> vector<32x64xf32>
    %52 = arith.addf %47, %51 : vector<32x64xf32>
    %c8 = arith.constant 8 : index
    %c0_38 = arith.constant 0 : index
    %c0_39 = arith.constant 0 : index
    %53 = vector.load %arg6[%c8, %c0_38, %c0_39] : memref<9x32x16xf32, #tpu.memory_space<vmem>>, vector<1x32x16xf32>
    %54 = vector.shape_cast %53 : vector<1x32x16xf32> to vector<32x16xf32>
    %55 = vector.extract_strided_slice %11 {offsets = [0, 512], sizes = [16, 64], strides = [1, 1]} : vector<16x576xf32> to vector<16x64xf32>
    %cst_40 = arith.constant dense<0.000000e+00> : vector<32x64xf32>
    %56 = tpu.matmul %54, %55, %cst_40 {dimension_numbers = #tpu.dot_dimension_numbers<[1], [0], [0], [1], [0, 0, 1, 1], [], []>} : vector<32x16xf32>, vector<16x64xf32>, vector<32x64xf32> -> vector<32x64xf32>
    %57 = arith.addf %52, %56 : vector<32x64xf32>
    %c0_41 = arith.constant 0 : index
    %c0_42 = arith.constant 0 : index
    %58 = vector.load %arg7[%c0_41, %c0_42] : memref<32x1xf32, #tpu.memory_space<vmem>>, vector<32x1xf32>
    %59 = vector.broadcast %58 : vector<32x1xf32> to vector<32x64xf32>
    %60 = arith.addf %57, %59 : vector<32x64xf32>
    %cst_43 = arith.constant 0.000000e+00 : f32
    %61 = vector.broadcast %cst_43 : f32 to vector<32x64xf32>
    %62 = arith.maximumf %60, %61 : vector<32x64xf32>
    %cst_44 = arith.constant dense<0.000000e+00> : vector<32xf32>
    %63 = vector.multi_reduction <add>, %62, %cst_44 [1] : vector<32x64xf32> to vector<32xf32>
    %64 = vector.shape_cast %63 : vector<32xf32> to vector<32x1xf32>
    %cst_45 = arith.constant 6.400000e+01 : f32
    %65 = vector.broadcast %cst_45 : f32 to vector<32x1xf32>
    %66 = arith.divf %64, %65 : vector<32x1xf32>
    %c0_46 = arith.constant 0 : index
    %c0_47 = arith.constant 0 : index
    %67 = vector.load %arg8[%c0_46, %c0_47] : memref<32x1xf32, #tpu.memory_space<vmem>>, vector<32x1xf32>
    tpu.vector_store %arg8[%c0_46, %c0_47], %66 {strides = array<i32>} : memref<32x1xf32, #tpu.memory_space<vmem>>, vector<32x1xf32>,
    return
  }
  func.func @transform_0(%arg0: i32) -> (i32, i32) {
    %c0_i32 = arith.constant 0 : i32
    %c0_i32_0 = arith.constant 0 : i32
    return %arg0, %c0_i32 : i32, i32
  }
  func.func @transform_1(%arg0: i32) -> (i32, i32) {
    %c0_i32 = arith.constant 0 : i32
    %c0_i32_0 = arith.constant 0 : i32
    %c0_i32_1 = arith.constant 0 : i32
    return %c0_i32, %c0_i32_0 : i32, i32
  }
  func.func @transform_2(%arg0: i32) -> (i32, i32) {
    %c0_i32 = arith.constant 0 : i32
    %c0_i32_0 = arith.constant 0 : i32
    %c0_i32_1 = arith.constant 0 : i32
    return %c0_i32, %c0_i32_0 : i32, i32
  }
  func.func @transform_3(%arg0: i32) -> (i32, i32) {
    %c0_i32 = arith.constant 0 : i32
    %c0_i32_0 = arith.constant 0 : i32
    %c0_i32_1 = arith.constant 0 : i32
    return %c0_i32, %c0_i32_0 : i32, i32
  }
  func.func @transform_4(%arg0: i32) -> (i32, i32) {
    %c0_i32 = arith.constant 0 : i32
    %c0_i32_0 = arith.constant 0 : i32
    %c0_i32_1 = arith.constant 0 : i32
    return %c0_i32, %c0_i32_0 : i32, i32
  }
  func.func @transform_5(%arg0: i32) -> (i32, i32, i32) {
    %c0_i32 = arith.constant 0 : i32
    %c0_i32_0 = arith.constant 0 : i32
    %c0_i32_1 = arith.constant 0 : i32
    %c0_i32_2 = arith.constant 0 : i32
    return %c0_i32, %c0_i32_0, %c0_i32_1 : i32, i32, i32
  }
  func.func @transform_6(%arg0: i32) -> (i32, i32) {
    %c0_i32 = arith.constant 0 : i32
    %c0_i32_0 = arith.constant 0 : i32
    %c0_i32_1 = arith.constant 0 : i32
    return %c0_i32, %c0_i32_0 : i32, i32
  }
  func.func @transform_7(%arg0: i32) -> (i32, i32) {
    %c0_i32 = arith.constant 0 : i32
    %c0_i32_0 = arith.constant 0 : i32
    return %arg0, %c0_i32 : i32, i32
  }
}

</mosaic_0001>

<bundles_post_ra>
// kernel: mul.4
= control target key start
LH: loop header
LB: loop body
LE: loop exit
PB: predicated region body
PF: predicated region fallthrough
CT: control target
= control target key end

     0   :  { %vm46_vm0 = vcmask 64512   ;;  %s184_s0 = inlined_call_operand.vmem [shape: f32[8,9,4], index: 0, kind: input, shape index: {}]   ;;  %s185_s1 = inlined_call_operand.vmem [shape: f32[8,36], index: 1, kind: output, shape index: {}]  }
   0x1   :  { %v95_v0 = vld [vmem:[%s184_s0 + $0x20] sm:$0xf]  ;;  %v96_v1 = vld [vmem:[%s184_s0 + $0x1c] sm:$0xf]  ;;  %v97_v2 = vld [vmem:[%s184_s0 + $0x18] sm:$0xf] }
   0x2   :  { %8 = vst [vmem:[#allocation0 + $0x40] sm:$0xf] %v95_v0  ;;  %13 = vst [vmem:[#allocation0 + $0x38] sm:$0xf] %v96_v1  ;;  %v98_v3 = vld [vmem:[%s184_s0 + $0x14] sm:$0xf] }
   0x3   :  { %18 = vst [vmem:[#allocation0 + $0x30] sm:$0xf] %v97_v2  ;;  %v99_v4 = vld [vmem:[%s184_s0 + $0x10] sm:$0xf]  ;;  %v100_v5 = vld [vmem:[%s184_s0 + $0xc] sm:$0xf] }
   0x4   :  { %23 = vst [vmem:[#allocation0 + $0x28] sm:$0xf] %v98_v3  ;;  %28 = vst [vmem:[#allocation0 + $0x20] sm:$0xf] %v99_v4  ;;  %v101_v6 = vld [vmem:[%s184_s0 + $0x8] sm:$0xf] }
   0x5   :  { %33 = vst [vmem:[#allocation0 + $0x18] sm:$0xf] %v100_v5  ;;  %v102_v7 = vld [vmem:[%s184_s0 + $0x4] sm:$0xf]  ;;  %v43_v8 = vld [vmem:[%s184_s0] sm:$0xf] }
   0x6   :  { %38 = vst [vmem:[#allocation0 + $0x10] sm:$0xf] %v101_v6  ;;  %42 = vst [vmem:[#allocation0 + $0x8] sm:$0xf] %v102_v7 }
   0x7   :  { %44 = vst [vmem:[#allocation0] sm:$0xf] %v43_v8 }
   0x9   :  { %v79_v10 = vld [vmem:[#allocation0 + $0x38] sm:$0xf]   ;;  %v84_v11 = vld [vmem:[#allocation0 + $0x40] sm:$0xf]  }
   0xa   :  { %v74_v9 = vld [vmem:[#allocation0 + $0x30] sm:$0xf]   ;;  %109 = vst.msk [vmem:[%s185_s1 + $0x1c] sm:$0xf] %vm46_vm0, %v79_v10   ;;  %110 = vst.msk [vmem:[%s185_s1 + $0x20] sm:$0xf] %vm46_vm0, %v84_v11  }
   0xb   :  { %v64_v13 = vld [vmem:[#allocation0 + $0x20] sm:$0xf]   ;;  %v69_v14 = vld [vmem:[#allocation0 + $0x28] sm:$0xf]   ;;  %108 = vst.msk [vmem:[%s185_s1 + $0x18] sm:$0xf] %vm46_vm0, %v74_v9  }
   0xc   :  { %v59_v12 = vld [vmem:[#allocation0 + $0x18] sm:$0xf]   ;;  %106 = vst.msk [vmem:[%s185_s1 + $0x10] sm:$0xf] %vm46_vm0, %v64_v13   ;;  %107 = vst.msk [vmem:[%s185_s1 + $0x14] sm:$0xf] %vm46_vm0, %v69_v14  }
   0xd   :  { %v49_v16 = vld [vmem:[#allocation0 + $0x8] sm:$0xf]   ;;  %v54_v17 = vld [vmem:[#allocation0 + $0x10] sm:$0xf]   ;;  %105 = vst.msk [vmem:[%s185_s1 + $0xc] sm:$0xf] %vm46_vm0, %v59_v12  }
   0xe   :  { %v45_v15 = vld [vmem:[#allocation0] sm:$0xf]   ;;  %103 = vst.msk [vmem:[%s185_s1 + $0x4] sm:$0xf] %vm46_vm0, %v49_v16   ;;  %104 = vst.msk [vmem:[%s185_s1 + $0x8] sm:$0xf] %vm46_vm0, %v54_v17  }
   0xf   :  { %47 = vst.msk [vmem:[%s185_s1] sm:$0xf] %vm46_vm0, %v45_v15  }

// kernel: tile.18
= control target key start
LH: loop header
LB: loop body
LE: loop exit
PB: predicated region body
PF: predicated region fallthrough
CT: control target
= control target key end

     0   :  { %s22_s0 = inlined_call_operand.vmem [shape: f32[16], index: 0, kind: input, shape index: {}]   ;;  %s23_s1 = inlined_call_operand.vmem [shape: f32[2,16], index: 1, kind: output, shape index: {}]  }
   0x1   :  { %v4_v0 = vld [vmem:[%s22_s0] ss:$0 sm:$0xff] }
   0x2   :  { %5 = vst [vmem:[%s23_s1] sm:$0x3] %v4_v0 }

// kernel: tile.13
= control target key start
LH: loop header
LB: loop body
LE: loop exit
PB: predicated region body
PF: predicated region fallthrough
CT: control target
= control target key end

     0   :  { %s22_s0 = inlined_call_operand.vmem [shape: f32[8], index: 0, kind: input, shape index: {}]   ;;  %s23_s1 = inlined_call_operand.vmem [shape: f32[2,8], index: 1, kind: output, shape index: {}]  }
   0x1   :  { %v4_v0 = vld [vmem:[%s22_s0] ss:$0 sm:$0xff] }
   0x2   :  { %5 = vst [vmem:[%s23_s1] sm:$0x3] %v4_v0 }

// kernel: tile.0
= control target key start
LH: loop header
LB: loop body
LE: loop exit
PB: predicated region body
PF: predicated region fallthrough
CT: control target
= control target key end

     0   :  { %s66_s8 = smov 125   ;;  %vm7_vm0 = vcmask 7168   ;;  %s67_s11 = smov 126   ;;  %s117_s0 = inlined_call_operand.vmem [shape: f32[2,8], index: 0, kind: input, shape index: {}]   ;;  %s118_s1 = inlined_call_operand.vmem [shape: f32[16,1], index: 1, kind: output, shape index: {}]  }
   0x1   :  { %v4_v0 = vld [vmem:[%s117_s0] sm:$0x3]  ;;  %s65_s0 = smov 127   ;;  %s68_s12 = smov 124  }
   0x2   :  { %5 = vst [vmem:[#allocation0] sm:$0x3] %v4_v0  ;;  %s69_s13 = smov 123   ;;  %s70_s14 = smov 122  }
   0x3   :  { %s71_s15 = smov 121  }
   0x9   :  { %v9_v1 = vld [vmem:[#allocation0] sm:$0x3]  }
   0xa   :  { %v21_v2 = vld [vmem:[#allocation0] sm:$0x3]   ;;  %10 = vrot.lane.b32.xlu0 %v9_v1, %s65_s0 }
   0xb   :  { %22 = vrot.lane.b32.xlu1 %v21_v2, %s66_s8  ;;  %v15_v3 = vld [vmem:[#allocation0] sm:$0x3]  }
   0xc   :  { %v27_v4 = vld [vmem:[#allocation0] sm:$0x3]  }
   0xd   :  { %v6_v5 = vld [vmem:[#allocation0] sm:$0x3]  }
   0xe   :  { %8 = vst.msk [vmem:[%s118_s1] ss:$8 sm:$0x3] %vm7_vm0, %v6_v5   ;;  %16 = vrot.lane.b32.xlu0 %v15_v3, %s67_s11  ;;  %v33_v6 = vld [vmem:[#allocation0] sm:$0x3]  }
   0xf   :  { %28 = vrot.lane.b32.xlu1 %v27_v4, %s68_s12  ;;  %v39_v7 = vld [vmem:[#allocation0] sm:$0x3]  }
  0x10   :  { %v45_v8 = vld [vmem:[#allocation0] sm:$0x3]  }
  0x12   :  { %34 = vrot.lane.b32.xlu0 %v33_v6, %s69_s13 }
  0x13   :  { %40 = vrot.lane.b32.xlu1 %v39_v7, %s70_s14 }
  0x16   :  { %46 = vrot.lane.b32.xlu0 %v45_v8, %s71_s15 }
  0x7c   :  { %v11_v9 = vpop.permute.xlu0 %10  }
  0x7d   :  { %v23_v10 = vpop.permute.xlu1 %22   ;;  %51 = vst.msk [vmem:[%s118_s1 + $0x1] ss:$8 sm:$0x3] %vm7_vm0, %v11_v9  }
  0x7e   :  { %53 = vst.msk [vmem:[%s118_s1 + $0x3] ss:$8 sm:$0x3] %vm7_vm0, %v23_v10  }
  0x80   :  { %v17_v11 = vpop.permute.xlu0 %16  }
  0x81   :  { %v29_v12 = vpop.permute.xlu1 %28   ;;  %52 = vst.msk [vmem:[%s118_s1 + $0x2] ss:$8 sm:$0x3] %vm7_vm0, %v17_v11  }
  0x82   :  { %54 = vst.msk [vmem:[%s118_s1 + $0x4] ss:$8 sm:$0x3] %vm7_vm0, %v29_v12  }
  0x84   :  { %v35_v13 = vpop.permute.xlu0 %34  }
  0x85   :  { %v41_v14 = vpop.permute.xlu1 %40   ;;  %55 = vst.msk [vmem:[%s118_s1 + $0x5] ss:$8 sm:$0x3] %vm7_vm0, %v35_v13  }
  0x86   :  { %56 = vst.msk [vmem:[%s118_s1 + $0x6] ss:$8 sm:$0x3] %vm7_vm0, %v41_v14  }
  0x88   :  { %v47_v15 = vpop.permute.xlu0 %46  }
  0x89   :  { %57 = vst.msk [vmem:[%s118_s1 + $0x7] ss:$8 sm:$0x3] %vm7_vm0, %v47_v15  }

// kernel: tile.1
= control target key start
LH: loop header
LB: loop body
LE: loop exit
PB: predicated region body
PF: predicated region fallthrough
CT: control target
= control target key end

     0   :  { %s130_s8 = smov 125   ;;  %s131_s9 = smov 126   ;;  %vm7_vm0 = vcmask 7168   ;;  %s221_s0 = inlined_call_operand.vmem [shape: f32[2,16], index: 0, kind: input, shape index: {}]   ;;  %s222_s1 = inlined_call_operand.vmem [shape: f32[32,1], index: 1, kind: output, shape index: {}]  }
   0x1   :  { %v4_v0 = vld [vmem:[%s221_s0] sm:$0x3]  ;;  %s129_s0 = smov 127   ;;  %s132_s10 = smov 124  }
   0x2   :  { %5 = vst [vmem:[#allocation0] sm:$0x3] %v4_v0  ;;  %s133_s11 = smov 123   ;;  %s134_s12 = smov 122  }
   0x3   :  { %s135_s13 = smov 121   ;;  %s136_s14 = smov 120  }
   0x4   :  { %s137_s17 = smov 119   ;;  %s138_s18 = smov 118  }
   0x5   :  { %s139_s19 = smov 117   ;;  %s140_s20 = smov 116  }
   0x6   :  { %s141_s21 = smov 115   ;;  %s142_s22 = smov 114  }
   0x7   :  { %s143_s23 = smov 113  }
   0x9   :  { %v9_v1 = vld [vmem:[#allocation0] sm:$0x3]  }
   0xa   :  { %v21_v2 = vld [vmem:[#allocation0] sm:$0x3]   ;;  %10 = vrot.lane.b32.xlu0 %v9_v1, %s129_s0 }
   0xb   :  { %22 = vrot.lane.b32.xlu1 %v21_v2, %s130_s8  ;;  %v15_v3 = vld [vmem:[#allocation0] sm:$0x3]  }
   0xc   :  { %v27_v4 = vld [vmem:[#allocation0] sm:$0x3]  }
   0xd   :  { %v33_v5 = vld [vmem:[#allocation0] sm:$0x3]  }
   0xe   :  { %16 = vrot.lane.b32.xlu0 %v15_v3, %s131_s9  ;;  %v39_v6 = vld [vmem:[#allocation0] sm:$0x3]  }
   0xf   :  { %28 = vrot.lane.b32.xlu1 %v27_v4, %s132_s10  ;;  %v45_v7 = vld [vmem:[#allocation0] sm:$0x3]  }
  0x10   :  { %v51_v8 = vld [vmem:[#allocation0] sm:$0x3]  }
  0x11   :  { %v57_v9 = vld [vmem:[#allocation0] sm:$0x3]  }
  0x12   :  { %34 = vrot.lane.b32.xlu0 %v33_v5, %s133_s11  ;;  %v63_v10 = vld [vmem:[#allocation0] sm:$0x3]  }
  0x13   :  { %40 = vrot.lane.b32.xlu1 %v39_v6, %s134_s12  ;;  %v6_v11 = vld [vmem:[#allocation0] sm:$0x3]  }
  0x14   :  { %8 = vst.msk [vmem:[%s222_s1] ss:$16 sm:$0x3] %vm7_vm0, %v6_v11   ;;  %v69_v12 = vld [vmem:[#allocation0] sm:$0x3]  }
  0x15   :  { %v75_v13 = vld [vmem:[#allocation0] sm:$0x3]  }
  0x16   :  { %46 = vrot.lane.b32.xlu0 %v45_v7, %s135_s13  ;;  %v81_v14 = vld [vmem:[#allocation0] sm:$0x3]  }
  0x17   :  { %52 = vrot.lane.b32.xlu1 %v51_v8, %s136_s14  ;;  %v87_v15 = vld [vmem:[#allocation0] sm:$0x3]  }
  0x18   :  { %v93_v16 = vld [vmem:[#allocation0] sm:$0x3]  }
  0x1a   :  { %58 = vrot.lane.b32.xlu0 %v57_v9, %s137_s17 }
  0x1b   :  { %64 = vrot.lane.b32.xlu1 %v63_v10, %s138_s18 }
  0x1e   :  { %70 = vrot.lane.b32.xlu0 %v69_v12, %s139_s19 }
  0x1f   :  { %76 = vrot.lane.b32.xlu1 %v75_v13, %s140_s20 }
  0x22   :  { %82 = vrot.lane.b32.xlu0 %v81_v14, %s141_s21 }
  0x23   :  { %88 = vrot.lane.b32.xlu1 %v87_v15, %s142_s22 }
  0x26   :  { %94 = vrot.lane.b32.xlu0 %v93_v16, %s143_s23 }
  0x7c   :  { %v11_v17 = vpop.permute.xlu0 %10  }
  0x7d   :  { %v23_v18 = vpop.permute.xlu1 %22   ;;  %99 = vst.msk [vmem:[%s222_s1 + $0x1] ss:$16 sm:$0x3] %vm7_vm0, %v11_v17  }
  0x7e   :  { %101 = vst.msk [vmem:[%s222_s1 + $0x3] ss:$16 sm:$0x3] %vm7_vm0, %v23_v18  }
  0x80   :  { %v17_v19 = vpop.permute.xlu0 %16  }
  0x81   :  { %v29_v20 = vpop.permute.xlu1 %28   ;;  %100 = vst.msk [vmem:[%s222_s1 + $0x2] ss:$16 sm:$0x3] %vm7_vm0, %v17_v19  }
  0x82   :  { %102 = vst.msk [vmem:[%s222_s1 + $0x4] ss:$16 sm:$0x3] %vm7_vm0, %v29_v20  }
  0x84   :  { %v35_v21 = vpop.permute.xlu0 %34  }
  0x85   :  { %v41_v22 = vpop.permute.xlu1 %40   ;;  %103 = vst.msk [vmem:[%s222_s1 + $0x5] ss:$16 sm:$0x3] %vm7_vm0, %v35_v21  }
  0x86   :  { %104 = vst.msk [vmem:[%s222_s1 + $0x6] ss:$16 sm:$0x3] %vm7_vm0, %v41_v22  }
  0x88   :  { %v47_v23 = vpop.permute.xlu0 %46  }
  0x89   :  { %v53_v24 = vpop.permute.xlu1 %52   ;;  %105 = vst.msk [vmem:[%s222_s1 + $0x7] ss:$16 sm:$0x3] %vm7_vm0, %v47_v23  }
  0x8a   :  { %106 = vst.msk [vmem:[%s222_s1 + $0x8] ss:$16 sm:$0x3] %vm7_vm0, %v53_v24  }
  0x8c   :  { %v59_v25 = vpop.permute.xlu0 %58  }
  0x8d   :  { %v65_v26 = vpop.permute.xlu1 %64   ;;  %107 = vst.msk [vmem:[%s222_s1 + $0x9] ss:$16 sm:$0x3] %vm7_vm0, %v59_v25  }
  0x8e   :  { %108 = vst.msk [vmem:[%s222_s1 + $0xa] ss:$16 sm:$0x3] %vm7_vm0, %v65_v26  }
  0x90   :  { %v71_v27 = vpop.permute.xlu0 %70  }
  0x91   :  { %v77_v28 = vpop.permute.xlu1 %76   ;;  %109 = vst.msk [vmem:[%s222_s1 + $0xb] ss:$16 sm:$0x3] %vm7_vm0, %v71_v27  }
  0x92   :  { %110 = vst.msk [vmem:[%s222_s1 + $0xc] ss:$16 sm:$0x3] %vm7_vm0, %v77_v28  }
  0x94   :  { %v83_v29 = vpop.permute.xlu0 %82  }
  0x95   :  { %v89_v30 = vpop.permute.xlu1 %88   ;;  %111 = vst.msk [vmem:[%s222_s1 + $0xd] ss:$16 sm:$0x3] %vm7_vm0, %v83_v29  }
  0x96   :  { %112 = vst.msk [vmem:[%s222_s1 + $0xe] ss:$16 sm:$0x3] %vm7_vm0, %v89_v30  }
  0x98   :  { %v95_v31 = vpop.permute.xlu0 %94  }
  0x99   :  { %113 = vst.msk [vmem:[%s222_s1 + $0xf] ss:$16 sm:$0x3] %vm7_vm0, %v95_v31  }

// kernel: feature_extractor_forward.1
= control target key start
LH: loop header
LB: loop body
LE: loop exit
PB: predicated region body
PF: predicated region fallthrough
CT: control target
= control target key end

     0   :  { %v2041_v3 = vmov 0.0   ;;  %v2042_v4 = vmov 0   ;;  %vm58_vm0 = vcmask 588800   ;;  %vm293_vm1 = vcmask 523264   ;;  %s2564_s0 = inlined_call_operand.vmem [shape: f32[72,256], index: 0, kind: input, shape index: {}]   ;;  %s2565_s2 = inlined_call_operand.vmem [shape: f32[16,1], index: 2, kind: input, shape index: {}]   ;;  %s2566_s3 = inlined_call_operand.vmem [shape: f32[256,64], index: 3, kind: input, shape index: {}]   ;;  %s2567_s1 = inlined_call_operand.vmem [shape: f32[16,72], index: 1, kind: input, shape index: {}]   ;;  %s2568_s4 = inlined_call_operand.vmem [shape: f32[64,576], index: 4, kind: input, shape index: {}]   ;;  %s2569_s5 = inlined_call_operand.vmem [shape: f32[9,32,16], index: 5, kind: input, shape index: {}]   ;;  %s2570_s6 = inlined_call_operand.vmem [shape: f32[32,1], index: 6, kind: input, shape index: {}]   ;;  %s2571_s7 = inlined_call_operand.vmem [shape: f32[32,1], index: 7, kind: output, shape index: {}]  }
   0x1   :  { %v29_v0 = vld [vmem:[%s2564_s0 + $0x8] sm:$0xff]  ;;  %v31_v1 = vld [vmem:[%s2564_s0 + $0x18] sm:$0xff]  ;;  %v28_v2 = vld [vmem:[%s2564_s0] sm:$0xff]  ;;  %129 = vmatprep.mubr.f32.mxu1 %v2041_v3  ;;  %2019 = vset.pattern.permute.xlu0 %v2042_v4  ;;  %vm546_vm2 = vcmask 130048   ;;  %vm1556_vm3 = vcmask 7168  }
   0x2   :  { %v1852_v5 = vpack.c.bf16 %v31_v1, %v29_v0  ;;  %v30_v6 = vld [vmem:[%s2564_s0 + $0x10] sm:$0xff]  ;;  %v33_v7 = vld [vmem:[%s2564_s0 + $0x28] sm:$0xff]  ;;  %v35_v8 = vld [vmem:[%s2564_s0 + $0x38] sm:$0xff]  ;;  %2040 = vset.pattern.permute.xlu1 %v2042_v4 }
   0x3   :  { %v1854_v9 = vpack.c.bf16 %v30_v6, %v28_v2  ;;  %v1856_v10 = vpack.c.bf16 %v35_v8, %v33_v7  ;;  %v32_v11 = vld [vmem:[%s2564_s0 + $0x20] sm:$0xff]  ;;  %v34_v12 = vld [vmem:[%s2564_s0 + $0x30] sm:$0xff]  ;;  %v37_v13 = vld [vmem:[%s2564_s0 + $0x48] sm:$0xff] }
   0x4   :  { %1853 = vmatprep.subr.bf16.mxu1 %v1852_v5  ;;  %v39_v14 = vld [vmem:[%s2564_s0 + $0x58] sm:$0xff]  ;;  %v1858_v15 = vpack.c.bf16 %v34_v12, %v32_v11  ;;  %v36_v17 = vld [vmem:[%s2564_s0 + $0x40] sm:$0xff]  ;;  %v38_v18 = vld [vmem:[%s2564_s0 + $0x50] sm:$0xff] }
   0x5   :  { %1855 = vmatpush1.bf16.msra.mxu1 %v1854_v9  ;;  %v1860_v16 = vpack.c.bf16 %v39_v14, %v37_v13  ;;  %v41_v19 = vld [vmem:[%s2564_s0 + $0x68] sm:$0xff]  ;;  %v43_v20 = vld [vmem:[%s2564_s0 + $0x78] sm:$0xff]  ;;  %v46_v21 = vld [vmem:[%s2565_s2] sm:$0xff]  ;;  %v1862_v22 = vpack.c.bf16 %v38_v18, %v36_v17 }
   0x6   :  { %1857 = vmatprep.subr.bf16.mxu1 %v1856_v10  ;;  %50 = vperm.xlu0 %2019, %v46_v21   ;;  %v47_v23 = vld [vmem:[%s2565_s2 + $0x8] sm:$0xff]  ;;  %v1864_v24 = vpack.c.bf16 %v43_v20, %v41_v19  ;;  %v40_v25 = vld [vmem:[%s2564_s0 + $0x60] sm:$0xff]  ;;  %v42_v26 = vld [vmem:[%s2564_s0 + $0x70] sm:$0xff] }
   0x7   :  { %v1866_v27 = vpack.c.bf16 %v42_v26, %v40_v25  ;;  %v45_v28 = vld [vmem:[%s2564_s0 + $0x88] sm:$0xff]  ;;  %v162_v29 = vld [vmem:[%s2566_s3 + $0x80] sm:$0xff]  ;;  %v164_v33 = vld [vmem:[%s2566_s3 + $0x90] sm:$0xff] }
   0x8   :  { %v163_v30 = vld [vmem:[%s2566_s3 + $0x88] sm:$0xff]  ;;  %v146_v31 = vld [vmem:[%s2566_s3] sm:$0xff]  ;;  %v165_v34 = vld [vmem:[%s2566_s3 + $0x98] sm:$0xff] }
   0x9   :  { %1859 = vmatpush1.bf16.msra.mxu1 %v1858_v15  ;;  %v147_v32 = vld [vmem:[%s2566_s3 + $0x8] sm:$0xff]  ;;  %v44_v35 = vld [vmem:[%s2564_s0 + $0x80] sm:$0xff]  ;;  %v1868_v36 = vpack.c.bf16 %v163_v30, %v162_v29  ;;  %v1872_v39 = vpack.c.bf16 %v165_v34, %v164_v33  ;;  %v148_v40 = vld [vmem:[%s2566_s3 + $0x10] sm:$0xff] }
   0xa   :  { %1861 = vmatprep.subr.bf16.mxu1 %v1860_v16  ;;  %55 = vperm.xlu0 %2019, %v47_v23   ;;  %v26_v37 = vld [vmem:[%s2567_s1] sm:$0xff]  ;;  %v1870_v38 = vpack.c.bf16 %v147_v32, %v146_v31  ;;  %v149_v41 = vld [vmem:[%s2566_s3 + $0x18] sm:$0xff]  ;;  %v167_v43 = vld [vmem:[%s2566_s3 + $0xa8] sm:$0xff] }
   0xb   :  { %v166_v42 = vld [vmem:[%s2566_s3 + $0xa0] sm:$0xff]  ;;  %v27_v44 = vld [vmem:[%s2567_s1 + $0x8] sm:$0xff]  ;;  %v1874_v45 = vpack.c.bf16 %v149_v41, %v148_v40  ;;  %v168_v49 = vld [vmem:[%s2566_s3 + $0xb0] sm:$0xff] }
   0xc   :  { %v1876_v46 = vpack.c.bf16 %v167_v43, %v166_v42  ;;  %v150_v47 = vld [vmem:[%s2566_s3 + $0x20] sm:$0xff]  ;;  %v151_v48 = vld [vmem:[%s2566_s3 + $0x28] sm:$0xff]  ;;  %v169_v50 = vld [vmem:[%s2566_s3 + $0xb8] sm:$0xff] }
   0xd   :  { %1863 = vmatpush1.bf16.msra.mxu1 %v1862_v22  ;;  %v1878_v51 = vpack.c.bf16 %v151_v48, %v150_v47  ;;  %v1880_v52 = vpack.c.bf16 %v169_v50, %v168_v49  ;;  %v152_v53 = vld [vmem:[%s2566_s3 + $0x30] sm:$0xff]  ;;  %v153_v54 = vld [vmem:[%s2566_s3 + $0x38] sm:$0xff]  ;;  %v170_v55 = vld [vmem:[%s2566_s3 + $0xc0] sm:$0xff] }
   0xe   :  { %1865 = vmatprep.subr.bf16.mxu1 %v1864_v24  ;;  %v171_v56 = vld [vmem:[%s2566_s3 + $0xc8] sm:$0xff]  ;;  %v1882_v57 = vpack.c.bf16 %v153_v54, %v152_v53  ;;  %v154_v59 = vld [vmem:[%s2566_s3 + $0x40] sm:$0xff]  ;;  %v172_v61 = vld [vmem:[%s2566_s3 + $0xd0] sm:$0xff] }
   0xf   :  { %v1884_v58 = vpack.c.bf16 %v171_v56, %v170_v55  ;;  %v155_v60 = vld [vmem:[%s2566_s3 + $0x48] sm:$0xff]  ;;  %v173_v62 = vld [vmem:[%s2566_s3 + $0xd8] sm:$0xff]  ;;  %v156_v1 = vld [vmem:[%s2566_s3 + $0x50] sm:$0xff] }
  0x10   :  { %v1886_v63 = vpack.c.bf16 %v155_v60, %v154_v59  ;;  %v1888_v0 = vpack.c.bf16 %v173_v62, %v172_v61  ;;  %v157_v2 = vld [vmem:[%s2566_s3 + $0x58] sm:$0xff]  ;;  %v174_v4 = vld [vmem:[%s2566_s3 + $0xe0] sm:$0xff]  ;;  %v175_v5 = vld [vmem:[%s2566_s3 + $0xe8] sm:$0xff] }
  0x11   :  { %1867 = vmatpush1.bf16.msra.mxu1 %v1866_v27  ;;  %v1890_v6 = vpack.c.bf16 %v157_v2, %v156_v1  ;;  %v1892_v7 = vpack.c.bf16 %v175_v5, %v174_v4  ;;  %v158_v8 = vld [vmem:[%s2566_s3 + $0x60] sm:$0xff]  ;;  %v159_v9 = vld [vmem:[%s2566_s3 + $0x68] sm:$0xff]  ;;  %v176_v11 = vld [vmem:[%s2566_s3 + $0xf0] sm:$0xff] }
  0x12   :  { %81 = vmatprep.subr.mxu1 %v45_v28  ;;  %v1894_v10 = vpack.c.bf16 %v159_v9, %v158_v8  ;;  %v177_v12 = vld [vmem:[%s2566_s3 + $0xf8] sm:$0xff]  ;;  %v160_v14 = vld [vmem:[%s2566_s3 + $0x70] sm:$0xff]  ;;  %v254_v17 = vld [vmem:[%s2568_s4 + $0x8] sm:$0xff] }
  0x13   :  { %v1896_v13 = vpack.c.bf16 %v177_v12, %v176_v11  ;;  %v161_v15 = vld [vmem:[%s2566_s3 + $0x78] sm:$0xff]  ;;  %v259_v18 = vld [vmem:[%s2568_s4 + $0x30] sm:$0xff]  ;;  %v257_v20 = vld [vmem:[%s2568_s4 + $0x20] sm:$0xff] }
  0x14   :  { %v1898_v16 = vpack.c.bf16 %v161_v15, %v160_v14  ;;  %v1900_v19 = vpack.c.bf16 %v259_v18, %v254_v17  ;;  %v262_v21 = vld [vmem:[%s2568_s4 + $0x48] sm:$0xff]  ;;  %v267_v23 = vld [vmem:[%s2568_s4 + $0x70] sm:$0xff]  ;;  %v272_v24 = vld [vmem:[%s2568_s4 + $0x98] sm:$0xff] }
  0x15   :  { %82 = vmatpush1.msra.mxu1 %v44_v35  ;;  %v1932_v22 = vpack.c.bf16 %v262_v21, %v257_v20  ;;  %v1936_v25 = vpack.c.bf16 %v272_v24, %v267_v23  ;;  %v253_v30 = vld [vmem:[%s2568_s4] sm:$0xff]  ;;  %v258_v31 = vld [vmem:[%s2568_s4 + $0x28] sm:$0xff]  ;;  %v264_v33 = vld [vmem:[%s2568_s4 + $0x58] sm:$0xff] }
  0x16   :  { %1565 = vmatmul.mubr.msk.f32.vlgmr.msra.gmra.mrb[0].mxu1 %vm58_vm0, %v26_v37  ;;  %1869 = vmatprep.subr.bf16.mxu1 %v1868_v36  ;;  %v269_v34 = vld [vmem:[%s2568_s4 + $0x80] sm:$0xff]  ;;  %v263_v43 = vld [vmem:[%s2568_s4 + $0x50] sm:$0xff]  ;;  %v278_v53 = vld [vmem:[%s2568_s4 + $0xc8] sm:$0xff] }
  0x17   :  { %135 = vmatprep.mubr.f32.mxu1 %v2041_v3  ;;  %1871 = vmatpush3.bf16.msra.mxu1 %v1870_v38  ;;  %v1902_v38 = vpack.c.bf16 %v258_v31, %v253_v30  ;;  %v1904_v42 = vpack.c.bf16 %v269_v34, %v264_v33  ;;  %v279_v47 = vld [vmem:[%s2568_s4 + $0xd0] sm:$0xff]  ;;  %v284_v54 = vld [vmem:[%s2568_s4 + $0xf8] sm:$0xff]  ;;  %v289_v55 = vld [vmem:[%s2568_s4 + $0x120] sm:$0xff] }
  0x18   :  { %1873 = vmatprep.subr.bf16.mxu1 %v1872_v39  ;;  %1933 = vmatprep.subr.bf16.mxu0 %v1932_v22  ;;  %v288_v59 = vld [vmem:[%s2568_s4 + $0x118] sm:$0xff]  ;;  %v277_v60 = vld [vmem:[%s2568_s4 + $0xc0] sm:$0xff]  ;;  %v282_v62 = vld [vmem:[%s2568_s4 + $0xe8] sm:$0xff] }
  0x19   :  { %1935 = vmatpush3.bf16.msra.mxu0 %v1932_v22  ;;  %v261_v1 = vld [vmem:[%s2568_s4 + $0x40] sm:$0xff]  ;;  %v287_v4 = vld [vmem:[%s2568_s4 + $0x110] sm:$0xff]  ;;  %v292_v5 = vld [vmem:[%s2568_s4 + $0x138] sm:$0xff] }
  0x1a   :  { %1566 = vmatmul.mubr.msk.f32.gmra.mrb[2].mxu1 %vm58_vm0, %v27_v44  ;;  %1937 = vmatprep.subr.bf16.mxu0 %v1936_v25  ;;  %v268_v44 = vld [vmem:[%s2568_s4 + $0x78] sm:$0xff]  ;;  %v266_v9 = vld [vmem:[%s2568_s4 + $0x68] sm:$0xff]  ;;  %v285_v31 = vld [vmem:[%s2568_s4 + $0x100] sm:$0xff] }
  0x1b   :  { %1875 = vmatpush3.bf16.msra.mxu1 %v1874_v45  ;;  %v1906_v49 = vpack.c.bf16 %v268_v44, %v263_v43  ;;  %v260_v8 = vld [vmem:[%s2568_s4 + $0x38] sm:$0xff]  ;;  %v270_v17 = vld [vmem:[%s2568_s4 + $0x88] sm:$0xff] }
  0x1c   :  { %1877 = vmatprep.subr.bf16.mxu1 %v1876_v46  ;;  %v274_v46 = vld [vmem:[%s2568_s4 + $0xa8] sm:$0xff]  ;;  %v276_v18 = vld [vmem:[%s2568_s4 + $0xb8] sm:$0xff] }
  0x1d   :  { %1939 = vmatpush3.bf16.msra.mxu0 %v1936_v25  ;;  %v275_v25 = vld [vmem:[%s2568_s4 + $0xb0] sm:$0xff] }
  0x1f   :  { %1879 = vmatpush3.bf16.msra.mxu1 %v1878_v51  ;;  %v1908_v51 = vpack.c.bf16 %v279_v47, %v274_v46 }
  0x20   :  { %1881 = vmatprep.subr.bf16.mxu1 %v1880_v52  ;;  %v273_v52 = vld [vmem:[%s2568_s4 + $0xa0] sm:$0xff] }
  0x21   :  { %v1910_v56 = vpack.c.bf16 %v278_v53, %v273_v52  ;;  %v1507_v53 = vld [vmem:[%s2570_s6] sm:$0xff] }
  0x23   :  { %1883 = vmatpush3.bf16.msra.mxu1 %v1882_v57  ;;  %v1912_v57 = vpack.c.bf16 %v289_v55, %v284_v54  ;;  %v1509_v54 = vld [vmem:[%s2570_s6 + $0x10] sm:$0xff]  ;;  %v1508_v55 = vld [vmem:[%s2570_s6 + $0x8] sm:$0xff] }
  0x24   :  { %1885 = vmatprep.subr.bf16.mxu1 %v1884_v58  ;;  %v283_v58 = vld [vmem:[%s2568_s4 + $0xf0] sm:$0xff] }
  0x25   :  { %v1914_v61 = vpack.c.bf16 %v288_v59, %v283_v58 }
  0x27   :  { %1887 = vmatpush3.bf16.msra.mxu1 %v1886_v63  ;;  %v1940_v63 = vpack.c.bf16 %v282_v62, %v277_v60  ;;  %v1575_v62 = vld [vmem:[%s2569_s5 + $0x30] sm:$0xff] }
  0x28   :  { %1889 = vmatprep.subr.bf16.mxu1 %v1888_v0  ;;  %v256_v0 = vld [vmem:[%s2568_s4 + $0x18] sm:$0xff] }
  0x29   :  { %1941 = vmatprep.subr.bf16.mxu0 %v1940_v63  ;;  %v1916_v2 = vpack.c.bf16 %v261_v1, %v256_v0  ;;  %v1576_v0 = vld [vmem:[%s2569_s5 + $0x38] sm:$0xff]  ;;  %v529_v1 = vld [vmem:[%s2569_s5] sm:$0xff] }
  0x2a   :  { %1943 = vmatpush3.bf16.msra.mxu0 %v1940_v63 }
  0x2b   :  { %1891 = vmatpush3.bf16.msra.mxu1 %v1890_v6  ;;  %v1944_v6 = vpack.c.bf16 %v292_v5, %v287_v4  ;;  %v530_v5 = vld [vmem:[%s2569_s5 + $0x8] sm:$0xff] }
  0x2c   :  { %1893 = vmatprep.subr.bf16.mxu1 %v1892_v7  ;;  %v255_v7 = vld [vmem:[%s2568_s4 + $0x10] sm:$0xff] }
  0x2d   :  { %1945 = vmatprep.subr.bf16.mxu0 %v1944_v6 }
  0x2e   :  { %1947 = vmatpush3.bf16.msra.mxu0 %v1944_v6  ;;  %v531_v6 = vld [vmem:[%s2569_s5 + $0x10] sm:$0xff] }
  0x2f   :  { %1895 = vmatpush3.bf16.msra.mxu1 %v1894_v10  ;;  %v271_v10 = vld [vmem:[%s2568_s4 + $0x90] sm:$0xff] }
  0x30   :  { %1897 = vmatprep.subr.bf16.mxu1 %v1896_v13  ;;  %v1918_v13 = vpack.c.bf16 %v260_v8, %v255_v7  ;;  %v1920_v15 = vpack.c.bf16 %v271_v10, %v266_v9  ;;  %v532_v8 = vld [vmem:[%s2569_s5 + $0x18] sm:$0xff]  ;;  %v1585_v9 = vld [vmem:[%s2569_s5 + $0x40] sm:$0xff]  ;;  %v1586_v10 = vld [vmem:[%s2569_s5 + $0x48] sm:$0xff] }
  0x33   :  { %1899 = vmatpush3.bf16.msra.mxu1 %v1898_v16  ;;  %v265_v16 = vld [vmem:[%s2568_s4 + $0x60] sm:$0xff] }
  0x34   :  { %1901 = vmatprep.subr.bf16.mxu1 %v1900_v19  ;;  %v281_v19 = vld [vmem:[%s2568_s4 + $0xe0] sm:$0xff]  ;;  %v1922_v22 = vpack.c.bf16 %v270_v17, %v265_v16  ;;  %v1594_v17 = vld [vmem:[%s2569_s5 + $0x68] sm:$0xff] }
  0x35   :  { %v1924_v24 = vpack.c.bf16 %v281_v19, %v276_v18  ;;  %v1595_v18 = vld [vmem:[%s2569_s5 + $0x70] sm:$0xff] }
  0x85   :  { %v51_v26 = vpop.permute.xlu0 %50 }
  0x89   :  { %v56_v35 = vpop.permute.xlu0 %55 }
  0xe9   :  { %v131_v27 = vpop.f32.mrb[0].mxu1 }
  0xea   :  { %v132_v28 = vadd.f32 %v131_v27, %v51_v26  ;;  %v133_v29 = vpop.f32.mrb[1].mxu1  ;;  %v286_v27 = vld [vmem:[%s2568_s4 + $0x108] sm:$0xff] }
  0xeb   :  { %v134_v32 = vadd.f32 %v133_v29, %v51_v26  ;;  %v280_v26 = vld [vmem:[%s2568_s4 + $0xd8] sm:$0xff] }
  0xec   :  { %v142_v39 = vmax.f32 %v132_v28, 0.0  ;;  %v291_v28 = vld [vmem:[%s2568_s4 + $0x130] sm:$0xff]  ;;  %v1926_v29 = vpack.c.bf16 %v280_v26, %v275_v25  ;;  %v1604_v25 = vld [vmem:[%s2569_s5 + $0x98] sm:$0xff]  ;;  %v1609_v26 = vld [vmem:[%s2569_s5 + $0xa0] sm:$0xff] }
  0xed   :  { %v143_v36 = vmax.f32 %v134_v32, 0.0  ;;  %v137_v37 = vpop.f32.mrb[2].mxu1  ;;  %v1928_v30 = vpack.c.bf16 %v291_v28, %v286_v27  ;;  %v290_v32 = vld [vmem:[%s2568_s4 + $0x128] sm:$0xff]  ;;  %s2043_s4 = smov 64  }
  0xee   :  { %v138_v40 = vadd.f32 %v137_v37, %v56_v35  ;;  %v139_v41 = vpop.f32.mrb[3].mxu1  ;;  %v1930_v33 = vpack.c.bf16 %v290_v32, %v285_v31  ;;  %v1612_v32 = vld [vmem:[%s2569_s5 + $0xb8] sm:$0xff] }
  0xef   :  { %v140_v45 = vadd.f32 %v139_v41, %v56_v35  ;;  %242 = vmatprep.mubr.f32.mxu1 %v143_v36  ;;  %v1573_v36 = vld [vmem:[%s2569_s5 + $0x20] sm:$0xff] }
  0xf0   :  { %243 = vmatmul.mubr.f32.vlgmr.msra.gmra.mrb[4].mxu1 %v142_v39  ;;  %v144_v50 = vmax.f32 %v138_v40, 0.0 }
  0xf1   :  { %v145_v48 = vmax.f32 %v140_v45, 0.0  ;;  %1903 = vmatpush1.bf16.msra.mxu1 %v1902_v38 }
  0xf2   :  { %1905 = vmatprep.subr.bf16.mxu1 %v1904_v42 }
  0xf3   :  { %247 = vmatprep.mubr.f32.mxu1 %v145_v48 }
  0xf4   :  { %248 = vmatmul.mubr.f32.gmra.mrb[6].mxu1 %v144_v50 }
  0xf5   :  { %1907 = vmatpush1.bf16.msra.mxu1 %v1906_v49  ;;  %364 = vmatprep.mubr.f32.mxu1 %v2041_v3 }
  0xf6   :  { %1909 = vmatprep.subr.bf16.mxu1 %v1908_v51 }
  0xf9   :  { %1911 = vmatpush1.bf16.msra.mxu1 %v1910_v56  ;;  %v1510_v56 = vld [vmem:[%s2570_s6 + $0x18] sm:$0xff] }
  0xfa   :  { %1913 = vmatprep.subr.bf16.mxu1 %v1912_v57 }
  0xfd   :  { %1915 = vmatpush1.bf16.msra.mxu1 %v1914_v61  ;;  %v1574_v61 = vld [vmem:[%s2569_s5 + $0x28] sm:$0xff] }
  0xfe   :  { %1917 = vmatprep.subr.bf16.mxu1 %v1916_v2 }
 0x1c3   :  { %v1673_v11 = vpop.f32.mrb[4].mxu1 }
 0x1c4   :  { %v1674_v12 = vpop.f32.mrb[5].mxu1 }
 0x1c5   :  { %v1675_v14 = vadd.f32 %v1674_v12, %v1673_v11  ;;  %v1587_v11 = vld [vmem:[%s2569_s5 + $0x50] sm:$0xff] }
 0x1c7   :  { %v1676_v20 = vpop.f32.mrb[6].mxu1  ;;  %1567 = vmatmul.mubr.msk.f32.vlgmr.msra.gmra.mrb[8].mxu1 %vm293_vm1, %v1675_v14  ;;  %1759 = vmatprep.mubr.msk.f32.mxu0 %vm293_vm1, %v1675_v14 }
 0x1c8   :  { %1919 = vmatpush1.bf16.msra.mxu1 %v1918_v13  ;;  %v1677_v21 = vpop.f32.mrb[7].mxu1  ;;  %370 = vmatprep.mubr.f32.mxu1 %v2041_v3  ;;  %v1588_v13 = vld [vmem:[%s2569_s5 + $0x58] sm:$0xff] }
 0x1c9   :  { %v1678_v23 = vadd.f32 %v1677_v21, %v1676_v20  ;;  %1921 = vmatprep.subr.bf16.mxu1 %v1920_v15  ;;  %v1596_v20 = vld [vmem:[%s2569_s5 + $0x78] sm:$0xff]  ;;  %v1601_v21 = vld [vmem:[%s2569_s5 + $0x80] sm:$0xff] }
 0x1cb   :  { %1568 = vmatmul.mubr.msk.f32.gmra.mrb[10].mxu1 %vm293_vm1, %v1678_v23  ;;  %1760 = vmatmul.mubr.msk.f32.vlgmr.msra.gmra.mrb[0].mxu0 %vm293_vm1, %v1678_v23 }
 0x1cc   :  { %1923 = vmatpush1.bf16.msra.mxu1 %v1922_v22  ;;  %441 = vmatprep.mubr.f32.mxu1 %v2041_v3  ;;  %v1602_v22 = vld [vmem:[%s2569_s5 + $0x88] sm:$0xff] }
 0x1cd   :  { %1925 = vmatprep.subr.bf16.mxu1 %v1924_v24  ;;  %1766 = vmatprep.mubr.msk.f32.mxu0 %vm546_vm2, %v1573_v36  ;;  %v1620_v36 = vld [vmem:[%s2569_s5 + $0xd8] sm:$0xff] }
 0x1d0   :  { %1927 = vmatpush1.bf16.msra.mxu1 %v1926_v29  ;;  %v1610_v29 = vld [vmem:[%s2569_s5 + $0xa8] sm:$0xff] }
 0x1d1   :  { %1929 = vmatprep.subr.bf16.mxu1 %v1928_v30  ;;  %v1611_v30 = vld [vmem:[%s2569_s5 + $0xb0] sm:$0xff] }
 0x1d4   :  { %1931 = vmatpush1.bf16.msra.mxu1 %v1930_v33  ;;  %v1617_v33 = vld [vmem:[%s2569_s5 + $0xc0] sm:$0xff] }
 0x1d7   :  { %1569 = vmatmul.mubr.msk.f32.vlgmr.msra.gmra.mrb[12].mxu1 %vm293_vm1, %v1675_v14  ;;  %v1593_v14 = vld [vmem:[%s2569_s5 + $0x60] sm:$0xff] }
 0x1d8   :  { %447 = vmatprep.mubr.f32.mxu1 %v2041_v3 }
 0x1db   :  { %1570 = vmatmul.mubr.msk.f32.gmra.mrb[14].mxu1 %vm293_vm1, %v1678_v23  ;;  %v1603_v23 = vld [vmem:[%s2569_s5 + $0x90] sm:$0xff] }
 0x29a   :  { %v366_v34 = vpop.f32.mrb[8].mxu1 }
 0x29b   :  { %v368_v35 = vpop.f32.mrb[9].mxu1 }
 0x29e   :  { %v372_v37 = vpop.f32.mrb[10].mxu1  ;;  %v1761_v38 = vpop.f32.mrb[0].mxu0 }
 0x29f   :  { %v1952_v39 = vpack.c.bf16 %v372_v37, %v366_v34  ;;  %v374_v40 = vpop.f32.mrb[11].mxu1  ;;  %v520_v41 = vpop.f32.mrb[1].mxu0  ;;  %v2020_v42 = vpack.i.bf16 %v372_v37, %v366_v34  ;;  %v1618_v34 = vld [vmem:[%s2569_s5 + $0xc8] sm:$0xff]  ;;  %v1625_v37 = vld [vmem:[%s2569_s5 + $0xe0] sm:$0xff] }
 0x2a0   :  { %v2025_v43 = vpack.i.bf16 %v374_v40, %v368_v35  ;;  %v1956_v44 = vpack.c.bf16 %v374_v40, %v368_v35  ;;  %v2384_v3 = vpack.c.bf16 %v1761_v38, %v520_v41  ;;  %v1619_v35 = vld [vmem:[%s2569_s5 + $0xd0] sm:$0xff]  ;;  %v1626_v38 = vld [vmem:[%s2569_s5 + $0xe8] sm:$0xff]  ;;  %v1628_v40 = vld [vmem:[%s2569_s5 + $0xf8] sm:$0xff] }
 0x2a1   :  { %2021 = vrot.lane.b32.xlu1 %v2020_v42, %s2043_s4  ;;  %v1633_v41 = vld [vmem:[%s2569_s5 + $0x100] sm:$0xff]  ;;  %v1634_v42 = vld [vmem:[%s2569_s5 + $0x108] sm:$0xff] }
 0x2a5   :  { %2026 = vrot.lane.b32.xlu1 %v2025_v43, %s2043_s4  ;;  %v1635_v43 = vld [vmem:[%s2569_s5 + $0x110] sm:$0xff] }
 0x2aa   :  { %v443_v45 = vpop.f32.mrb[12].mxu1 }
 0x2ab   :  { %v445_v46 = vpop.f32.mrb[13].mxu1 }
 0x2ae   :  { %v449_v47 = vpop.f32.mrb[14].mxu1 }
 0x2af   :  { %v2030_v48 = vpack.i.bf16 %v449_v47, %v443_v45  ;;  %v2386_v49 = vpack.c.bf16 %v449_v47, %v443_v45  ;;  %v451_v50 = vpop.f32.mrb[15].mxu1 }
 0x2b0   :  { %v2035_v51 = vpack.i.bf16 %v451_v50, %v445_v46  ;;  %v2388_v52 = vpack.c.bf16 %v451_v50, %v445_v46 }
 0x2b1   :  { %2031 = vrot.lane.b32.xlu0 %v2030_v48, %s2043_s4 }
 0x2b2   :  { %2036 = vrot.lane.b32.xlu1 %v2035_v51, %s2043_s4 }
 0x2b5   :  { %1513 = vperm.xlu0 %2019, %v1507_v53  }
 0x2b6   :  { %1518 = vperm.xlu1 %2040, %v1508_v55  }
 0x2b9   :  { %1523 = vperm.xlu0 %2019, %v1509_v54  }
 0x2ba   :  { %1528 = vperm.xlu1 %2040, %v1510_v56  }
 0x313   :  { %v2022_v57 = vpop.permute.xlu1 %2021 }
 0x314   :  { %v2024_v58 = vunpack.i.h.bf16 %v2022_v57  ;;  %v2023_v59 = vunpack.i.l.bf16 %v2022_v57 }
 0x316   :  { %v1948_v60 = vpack.c.bf16 %v2024_v58, %v2023_v59 }
 0x317   :  { %v2027_v63 = vpop.permute.xlu1 %2026 }
 0x318   :  { %1949 = vmatprep.subr.bf16.mxu0 %v1948_v60  ;;  %v2029_v2 = vunpack.i.h.bf16 %v2027_v63  ;;  %v2028_v4 = vunpack.i.l.bf16 %v2027_v63 }
 0x319   :  { %1951 = vmatpush3.bf16.msra.mxu0 %v1948_v60 }
 0x31a   :  { %1953 = vmatprep.subr.bf16.mxu0 %v1952_v39  ;;  %v1960_v7 = vpack.c.bf16 %v2029_v2, %v2028_v4 }
 0x31c   :  { %1767 = vmatmul.mubr.msk.f32.vlgmr.msra.gmra.mrb[2].mxu0 %vm546_vm2, %v1574_v61 }
 0x31d   :  { %1955 = vmatpush3.bf16.msra.mxu0 %v1952_v39  ;;  %1769 = vmatprep.mubr.msk.f32.mxu0 %vm546_vm2, %v1575_v62  ;;  %v1627_v39 = vld [vmem:[%s2569_s5 + $0xf0] sm:$0xff] }
 0x31e   :  { %1957 = vmatprep.subr.bf16.mxu0 %v1956_v44 }
 0x320   :  { %1770 = vmatmul.mubr.msk.f32.gmra.mrb[4].mxu0 %vm546_vm2, %v1576_v0 }
 0x321   :  { %1776 = vmatprep.mubr.msk.f32.mxu0 %vm546_vm2, %v529_v1 }
 0x323   :  { %v2032_v12 = vpop.permute.xlu0 %2031 }
 0x324   :  { %1777 = vmatmul.mubr.msk.f32.vlgmr.msra.gmra.mrb[2].mxu0 %vm546_vm2, %v530_v5  ;;  %v2034_v15 = vunpack.i.h.bf16 %v2032_v12  ;;  %v2033_v16 = vunpack.i.l.bf16 %v2032_v12  ;;  %v2037_v24 = vpop.permute.xlu1 %2036 }
 0x325   :  { %1959 = vmatpush3.bf16.msra.mxu0 %v1956_v44  ;;  %1779 = vmatprep.mubr.msk.f32.mxu0 %vm546_vm2, %v531_v6  ;;  %v2039_v27 = vunpack.i.h.bf16 %v2037_v24  ;;  %v2038_v28 = vunpack.i.l.bf16 %v2037_v24  ;;  %v1636_v44 = vld [vmem:[%s2569_s5 + $0x118] sm:$0xff] }
 0x326   :  { %1961 = vmatprep.subr.bf16.mxu0 %v1960_v7  ;;  %v1968_v19 = vpack.c.bf16 %v2034_v15, %v2033_v16 }
 0x327   :  { %v1976_v31 = vpack.c.bf16 %v2039_v27, %v2038_v28 }
 0x328   :  { %1780 = vmatmul.mubr.msk.f32.gmra.mrb[4].mxu0 %vm546_vm2, %v532_v8 }
 0x329   :  { %1786 = vmatprep.mubr.msk.f32.mxu0 %vm546_vm2, %v1585_v9 }
 0x32c   :  { %1787 = vmatmul.mubr.msk.f32.vlgmr.msra.gmra.mrb[2].mxu0 %vm546_vm2, %v1586_v10 }
 0x32d   :  { %1963 = vmatpush3.bf16.msra.mxu0 %v1960_v7  ;;  %1789 = vmatprep.mubr.msk.f32.mxu0 %vm546_vm2, %v1587_v11 }
 0x32e   :  { %1965 = vmatprep.subr.bf16.mxu0 %v2386_v49 }
 0x330   :  { %1790 = vmatmul.mubr.msk.f32.gmra.mrb[4].mxu0 %vm546_vm2, %v1588_v13 }
 0x331   :  { %1796 = vmatprep.mubr.msk.f32.mxu0 %vm546_vm2, %v1593_v14 }
 0x334   :  { %1797 = vmatmul.mubr.msk.f32.vlgmr.msra.gmra.mrb[2].mxu0 %vm546_vm2, %v1594_v17  ;;  %v1514_v45 = vpop.permute.xlu0 %1513 }
 0x335   :  { %1967 = vmatpush3.bf16.msra.mxu0 %v2386_v49  ;;  %1799 = vmatprep.mubr.msk.f32.mxu0 %vm546_vm2, %v1595_v18 }
 0x336   :  { %1969 = vmatprep.subr.bf16.mxu0 %v1968_v19 }
 0x338   :  { %1800 = vmatmul.mubr.msk.f32.gmra.mrb[4].mxu0 %vm546_vm2, %v1596_v20  ;;  %v1524_v54 = vpop.permute.xlu0 %1523 }
 0x339   :  { %1806 = vmatprep.mubr.msk.f32.mxu0 %vm546_vm2, %v1601_v21 }
 0x33c   :  { %1807 = vmatmul.mubr.msk.f32.vlgmr.msra.gmra.mrb[2].mxu0 %vm546_vm2, %v1602_v22 }
 0x33d   :  { %1971 = vmatpush3.bf16.msra.mxu0 %v1968_v19  ;;  %1809 = vmatprep.mubr.msk.f32.mxu0 %vm546_vm2, %v1603_v23 }
 0x33e   :  { %1973 = vmatprep.subr.bf16.mxu0 %v2388_v52 }
 0x340   :  { %1810 = vmatmul.mubr.msk.f32.gmra.mrb[4].mxu0 %vm546_vm2, %v1604_v25 }
 0x341   :  { %1816 = vmatprep.mubr.msk.f32.mxu0 %vm546_vm2, %v1609_v26 }
 0x344   :  { %1817 = vmatmul.mubr.msk.f32.vlgmr.msra.gmra.mrb[2].mxu0 %vm546_vm2, %v1610_v29 }
 0x345   :  { %1975 = vmatpush3.bf16.msra.mxu0 %v2388_v52  ;;  %1819 = vmatprep.mubr.msk.f32.mxu0 %vm546_vm2, %v1611_v30 }
 0x346   :  { %1977 = vmatprep.subr.bf16.mxu0 %v1976_v31 }
 0x348   :  { %1820 = vmatmul.mubr.msk.f32.gmra.mrb[4].mxu0 %vm546_vm2, %v1612_v32 }
 0x349   :  { %1826 = vmatprep.mubr.msk.f32.mxu0 %vm546_vm2, %v1617_v33 }
 0x34c   :  { %1827 = vmatmul.mubr.msk.f32.vlgmr.msra.gmra.mrb[2].mxu0 %vm546_vm2, %v1618_v34 }
 0x34d   :  { %1979 = vmatpush3.bf16.msra.mxu0 %v1976_v31  ;;  %1829 = vmatprep.mubr.msk.f32.mxu0 %vm546_vm2, %v1619_v35 }
 0x34e   :  { %1981 = vmatprep.subr.bf16.mxu0 %v2384_v3 }
 0x350   :  { %1830 = vmatmul.mubr.msk.f32.gmra.mrb[4].mxu0 %vm546_vm2, %v1620_v36 }
 0x351   :  { %1836 = vmatprep.mubr.msk.f32.mxu0 %vm546_vm2, %v1625_v37 }
 0x354   :  { %1837 = vmatmul.mubr.msk.f32.vlgmr.msra.gmra.mrb[2].mxu0 %vm546_vm2, %v1626_v38 }
 0x355   :  { %1983 = vmatpush3.bf16.msra.mxu0 %v2384_v3  ;;  %1839 = vmatprep.mubr.msk.f32.mxu0 %vm546_vm2, %v1627_v39  ;;  %v1519_v3 = vpop.permute.xlu1 %1518 }
 0x358   :  { %1840 = vmatmul.mubr.msk.f32.gmra.mrb[4].mxu0 %vm546_vm2, %v1628_v40 }
 0x359   :  { %1846 = vmatprep.mubr.msk.f32.mxu0 %vm546_vm2, %v1633_v41  ;;  %v1529_v51 = vpop.permute.xlu1 %1528 }
 0x35c   :  { %1847 = vmatmul.mubr.msk.f32.vlgmr.msra.gmra.mrb[2].mxu0 %vm546_vm2, %v1634_v42 }
 0x35d   :  { %1849 = vmatprep.mubr.msk.f32.mxu0 %vm546_vm2, %v1635_v43 }
 0x360   :  { %1850 = vmatmul.mubr.msk.f32.gmra.mrb[4].mxu0 %vm546_vm2, %v1636_v44 }
 0x42f   :  { %v1848_v46 = vpop.f32.mrb[2].mxu0 }
 0x430   :  { %v1532_v47 = vadd.f32 %v1848_v46, %v1519_v3  ;;  %v1484_v48 = vpop.f32.mrb[3].mxu0 }
 0x431   :  { %v1531_v49 = vadd.f32 %v1514_v45, %v1484_v48 }
 0x432   :  { %v1536_v50 = vmax.f32 %v1532_v47, 0.0 }
 0x433   :  { %v1535_v52 = vmax.f32 %v1531_v49, 0.0  ;;  %v1851_v53 = vpop.f32.mrb[4].mxu0 }
 0x434   :  { %v1494_v55 = vpop.f32.mrb[5].mxu0  ;;  %v1542_v56 = vsel %vm293_vm1, %v1536_v50, 0.0  ;;  %v1534_v57 = vadd.f32 %v1851_v53, %v1529_v51 }
 0x435   :  { %v1533_v58 = vadd.f32 %v1524_v54, %v1494_v55  ;;  %1543 = vadd.xlane.f32.xlu1 %v1542_v56  ;;  %v1539_v59 = vsel %vm293_vm1, %v1535_v52, 0.0 }
 0x436   :  { %1540 = vadd.xlane.f32.xlu0 %v1539_v59  ;;  %v1538_v61 = vmax.f32 %v1534_v57, 0.0 }
 0x437   :  { %v1537_v60 = vmax.f32 %v1533_v58, 0.0 }
 0x438   :  { %v1548_v63 = vsel %vm293_vm1, %v1538_v61, 0.0 }
 0x439   :  { %v1545_v62 = vsel %vm293_vm1, %v1537_v60, 0.0 }
 0x43a   :  { %1546 = vadd.xlane.f32.xlu0 %v1545_v62 }
 0x43e   :  { %1549 = vadd.xlane.f32.xlu0 %v1548_v63 }
 0x4c2   :  { %v1544_v0 = vpop.xlane.xlu1 %1543 }
 0x4c3   :  { %v1553_v1 = vmul.f32 0.015625, %v1544_v0  ;;  %v1541_v2 = vpop.xlane.xlu0 %1540 }
 0x4c4   :  { %v1552_v4 = vmul.f32 0.015625, %v1541_v2 }
 0x4c5   :  { %1558 = vst.msk [vmem:[%s2571_s7 + $0x8] sm:$0xff] %vm1556_vm3, %v1553_v1 }
 0x4c6   :  { %1557 = vst.msk [vmem:[%s2571_s7] sm:$0xff] %vm1556_vm3, %v1552_v4 }
 0x4c7   :  { %v1547_v5 = vpop.xlane.xlu0 %1546 }
 0x4c8   :  { %v1554_v6 = vmul.f32 0.015625, %v1547_v5 }
 0x4ca   :  { %1559 = vst.msk [vmem:[%s2571_s7 + $0x10] sm:$0xff] %vm1556_vm3, %v1554_v6 }
 0x4cb   :  { %v1550_v7 = vpop.xlane.xlu0 %1549 }
 0x4cc   :  { %v1555_v8 = vmul.f32 0.015625, %v1550_v7 }
 0x4ce   :  { %1560 = vst.msk [vmem:[%s2571_s7 + $0x18] sm:$0xff] %vm1556_vm3, %v1555_v8 }

</bundles_post_ra>
